<compile_context>
chip_gen: v5e
topology: v5e:2x2
jax: 0.10.0
libtpu: 0.0.40
codegen_flags: <defaults>
</compile_context>

<pallas_src>
import functools

import jax
import jax.numpy as jnp
from jax.experimental import pallas as pl
from jax.experimental.pallas import tpu as pltpu


_PER_BUFFER_BUDGET_BYTES = 3 * 1024 * 1024   # per input tile (dtype-aware rows below)
_VMEM_LIMIT_BYTES = 48 * 1024 * 1024         # explicit scoped-VMEM limit (safe on v5e/v6e/v7x)


def _kl_kernel(z_mean_ref, z_logvar_ref, kl_ref, partial_ref, *, last_tile_rows):
    mu = z_mean_ref[...].astype(jnp.float32)
    lv = z_logvar_ref[...].astype(jnp.float32)

    # Elementwise KL term: VPU adds/muls + EUP exp.
    inner = 1.0 + lv - mu * mu - jnp.exp(lv)                        # [TB, L], f32
    kl_ref[...] = (-0.5 * inner).astype(kl_ref.dtype)

    # Per-tile per-lane partial sums (sublane reduce only, lane-dense store).
    partial_ref[0] = jnp.sum(inner, axis=0, keepdims=True)          # (1, L)

    if last_tile_rows is not None:
        # Ragged batch: only the LAST grid step has padded (undefined) rows; redo the
        # partial there with a select (select discards NaN/Inf from exp on padding).
        # The padded kl rows are dropped by Pallas on ragged-output writeback.
        @pl.when(pl.program_id(0) == pl.num_programs(0) - 1)
        def _():
            row = jax.lax.broadcasted_iota(jnp.int32, inner.shape, 0)
            masked = jnp.where(row < last_tile_rows, inner, 0.0)
            partial_ref[0] = jnp.sum(masked, axis=0, keepdims=True)


def _dimension_semantics(num_tiles):
    """CORE_PARALLEL on v7x (2 TCs per chip) so both cores issue DMAs; else 'parallel'."""
    if num_tiles >= 2:
        try:
            kind = jax.devices()[0].device_kind.lower()
        except Exception:  # pragma: no cover
            kind = ""
        if "v7" in kind:
            return (pltpu.CORE_PARALLEL,)
    return ("parallel",)


def _choose_tiling(rows, lanes, itemsize, override=None):
    """Pick (tile_rows, num_tiles): dtype-aware byte budget, balanced, multiple of 8."""
    if override is not None:
        tb = max(1, min(override, rows))         # override should be a multiple of 8
        return tb, pl.cdiv(rows, tb)
    tb = _PER_BUFFER_BUDGET_BYTES // max(1, lanes * itemsize)
    tb = max(8, (tb // 8) * 8)
    if tb >= rows:
        return rows, 1                           # single block == full array dims (legal)
    nt = pl.cdiv(rows, tb)
    # Rebalance so the last tile is (nearly) full while staying a multiple of 8 rows.
    tb = ((pl.cdiv(rows, nt) + 7) // 8) * 8
    nt = pl.cdiv(rows, tb)
    return tb, nt


def _run_kl(z_mean2d, z_logvar2d, *, kl_dtype, tile_rows, num_tiles, last_tile_rows):
    rows, lanes = z_mean2d.shape
    kernel = functools.partial(_kl_kernel, last_tile_rows=last_tile_rows)

    in_bytes = rows * lanes * (z_mean2d.dtype.itemsize + z_logvar2d.dtype.itemsize)
    out_bytes = rows * lanes * jnp.dtype(kl_dtype).itemsize + num_tiles * lanes * 4

    def _call(dim_sem):
        return pl.pallas_call(
            kernel,
            grid=(num_tiles,),
            in_specs=[
                pl.BlockSpec((tile_rows, lanes), lambda i: (i, 0)),
                pl.BlockSpec((tile_rows, lanes), lambda i: (i, 0)),
            ],
            out_specs=(
                pl.BlockSpec((tile_rows, lanes), lambda i: (i, 0)),
                pl.BlockSpec((1, 1, lanes), lambda i: (i, 0, 0)),
            ),
            out_shape=(
                jax.ShapeDtypeStruct((rows, lanes), kl_dtype),               # kl (elementwise)
                jax.ShapeDtypeStruct((num_tiles, 1, lanes), jnp.float32),    # loss partials
            ),
            compiler_params=pltpu.CompilerParams(
                dimension_semantics=dim_sem,
                vmem_limit_bytes=_VMEM_LIMIT_BYTES,
            ),
            cost_estimate=pl.CostEstimate(
                flops=5 * rows * lanes,
                transcendentals=rows * lanes,
                bytes_accessed=in_bytes + out_bytes,
            ),
        )(z_mean2d, z_logvar2d)

    dim_sem = _dimension_semantics(num_tiles)
    try:
        return _call(dim_sem)
    except Exception:
        if dim_sem == ("parallel",):
            raise
        return _call(("parallel",))              # defensive fallback if CORE_PARALLEL rejects


def latent_forward(data, *, tile_rows=None):
    """JAX/Pallas equivalent of Latent.forward; mutates/returns the dict like the torch module."""
    z_mean = data["z_mean"]
    z_logvar = data["z_logvar"]
    assert z_mean.shape == z_logvar.shape and z_mean.ndim >= 2, "expected [B, D, ...] latents"

    shape = z_mean.shape
    numel = z_mean.size
    denom = numel // shape[1]                    # torch: mean over all dims except dim=1
    kl_dtype = jnp.result_type(z_mean.dtype, z_logvar.dtype)
    itemsize = max(z_mean.dtype.itemsize, z_logvar.dtype.itemsize)

    last_dim = shape[-1]
    if last_dim % 128 == 0:
        # Already lane-dense: view as a (rows, last_dim) slab (free reshape for ndim == 2).
        rows = numel // last_dim
        zm2 = z_mean.reshape(rows, last_dim)
        zl2 = z_logvar.reshape(rows, last_dim)
        tb, nt = _choose_tiling(rows, last_dim, itemsize, tile_rows)
        last_valid = rows - tb * (nt - 1)
        last = None if last_valid == tb else last_valid
        kl2, partials = _run_kl(zm2, zl2, kl_dtype=kl_dtype, tile_rows=tb,
                                num_tiles=nt, last_tile_rows=last)
        kl = kl2.reshape(shape)
    else:
        # Small / odd last dim: flatten + zero-pad into a lane-dense slab.
        # Zero padding contributes exactly 0 to the loss (1 + 0 - 0 - exp(0) == 0).
        lanes = 1024 if numel >= 1024 else 128
        rows = pl.cdiv(numel, lanes)
        tb, nt = _choose_tiling(rows, lanes, itemsize, tile_rows)
        rows_pad = tb * nt
        pad = rows_pad * lanes - numel
        zm2 = jnp.pad(jnp.ravel(z_mean), (0, pad)).reshape(rows_pad, lanes)
        zl2 = jnp.pad(jnp.ravel(z_logvar), (0, pad)).reshape(rows_pad, lanes)
        kl2, partials = _run_kl(zm2, zl2, kl_dtype=kl_dtype, tile_rows=tb,
                                num_tiles=nt, last_tile_rows=None)
        kl = jnp.ravel(kl2)[:numel].reshape(shape)

    # Fold -0.5 and 1/denom into one static constant; tiny O(num_tiles * lanes) finish in XLA.
    kl_loss = jnp.sum(partials, dtype=jnp.float32) * jnp.float32(-0.5 / denom)

    data["kl"] = kl
    data["kl_loss"] = kl_loss
    return data


def _reference(z_mean, z_logvar):
    zm = z_mean.astype(jnp.float32)
    zl = z_logvar.astype(jnp.float32)
    inner = 1.0 + zl - zm * zm - jnp.exp(zl)
    return -0.5 * inner, jnp.mean(-0.5 * jnp.sum(inner, axis=1))


if __name__ == "__main__":
    key = jax.random.PRNGKey(0)
    keys = jax.random.split(key, 10)

    def _check(zm, zl, kl_tol, loss_tol, tile_rows=None):
        out = latent_forward({"z_mean": zm, "z_logvar": zl}, tile_rows=tile_rows)
        jax.block_until_ready(out["kl"])
        jax.block_until_ready(out["kl_loss"])
        kl_ref, loss_ref = _reference(zm, zl)
        assert jnp.allclose(out["kl"].astype(jnp.float32), kl_ref, atol=kl_tol, rtol=kl_tol)
        assert jnp.allclose(out["kl_loss"], loss_ref, atol=loss_tol, rtol=loss_tol)

    # Case 1: aligned [8, 128] f32 latent (single block, aligned-D path).
    zm = jax.random.normal(keys[0], (8, 128), dtype=jnp.float32)
    zl = 0.1 * jax.random.normal(keys[1], (8, 128), dtype=jnp.float32)
    _check(zm, zl, 1e-5, 1e-5)

    # Case 2: forced multi-tile grid with ragged last tile (pl.when masking path).
    zm = jax.random.normal(keys[2], (20, 128), dtype=jnp.float32)
    zl = 0.1 * jax.random.normal(keys[3], (20, 128), dtype=jnp.float32)
    _check(zm, zl, 1e-5, 1e-5, tile_rows=8)

    # Case 3: small odd latent dim [4, 10] -> lane-dense flatten + zero-pad slab path.
    zm = jax.random.normal(keys[4], (4, 10), dtype=jnp.float32)
    zl = 0.1 * jax.random.normal(keys[5], (4, 10), dtype=jnp.float32)
    _check(zm, zl, 1e-5, 1e-5)

    # Case 4: conv-style 4-D latent [2, 4, 16, 16] (sum over dim=1, mean over the rest).
    zm = jax.random.normal(keys[6], (2, 4, 16, 16), dtype=jnp.float32)
    zl = 0.1 * jax.random.normal(keys[7], (2, 4, 16, 16), dtype=jnp.float32)
    _check(zm, zl, 1e-5, 1e-5)

    # Case 5: bf16 inputs (dtype-aware tiling; kl returned in bf16, loss in f32).
    zm = jax.random.normal(keys[8], (16, 64), dtype=jnp.bfloat16)
    zl = (0.1 * jax.random.normal(keys[9], (16, 64), dtype=jnp.float32)).astype(jnp.bfloat16)
    _check(zm, zl, 2e-2, 1e-4)

    print("KERNEL_OK")
</pallas_src>

<mosaic_0001>
module attributes {stable_mosaic.version = 11 : i64} {
  func.func @_kl_kernel(%arg0: i32, %arg1: memref<8x128xf32, #tpu.memory_space<vmem>>, %arg2: memref<8x128xf32, #tpu.memory_space<vmem>>, %arg3: memref<8x128xf32, #tpu.memory_space<vmem>>, %arg4: memref<1x1x128xf32, #tpu.memory_space<vmem>>) attributes {dimension_semantics = [#tpu.dimension_semantics<parallel>], iteration_bounds = array<i64: 1>, scalar_prefetch = 0 : i64, scratch_operands = 0 : i64, tpu.core_type = #tpu.core_type<tc>, window_params = [{transform_indices = @transform_0, window_bounds = array<i64: 8, 128>}, {transform_indices = @transform_1, window_bounds = array<i64: 8, 128>}, {transform_indices = @transform_2, window_bounds = array<i64: 8, 128>}, {transform_indices = @transform_3, window_bounds = array<i64: 1, 1, 128>}]} {
    %c0 = arith.constant 0 : index
    %c0_0 = arith.constant 0 : index
    %0 = vector.load %arg1[%c0, %c0_0] : memref<8x128xf32, #tpu.memory_space<vmem>>, vector<8x128xf32>
    %c0_1 = arith.constant 0 : index
    %c0_2 = arith.constant 0 : index
    %1 = vector.load %arg2[%c0_1, %c0_2] : memref<8x128xf32, #tpu.memory_space<vmem>>, vector<8x128xf32>
    %cst = arith.constant 1.000000e+00 : f32
    %2 = vector.broadcast %cst : f32 to vector<8x128xf32>
    %3 = arith.addf %2, %1 : vector<8x128xf32>
    %4 = arith.mulf %0, %0 : vector<8x128xf32>
    %5 = arith.subf %3, %4 : vector<8x128xf32>
    %6 = math.exp %1 : vector<8x128xf32>
    %7 = arith.subf %5, %6 : vector<8x128xf32>
    %cst_3 = arith.constant -5.000000e-01 : f32
    %8 = vector.broadcast %cst_3 : f32 to vector<8x128xf32>
    %9 = arith.mulf %8, %7 : vector<8x128xf32>
    %c0_4 = arith.constant 0 : index
    %c0_5 = arith.constant 0 : index
    %10 = vector.load %arg3[%c0_4, %c0_5] : memref<8x128xf32, #tpu.memory_space<vmem>>, vector<8x128xf32>
    tpu.vector_store %arg3[%c0_4, %c0_5], %9 {strides = array<i32>} : memref<8x128xf32, #tpu.memory_space<vmem>>, vector<8x128xf32>,
    %cst_6 = arith.constant dense<0.000000e+00> : vector<128xf32>
    %11 = vector.multi_reduction <add>, %7, %cst_6 [0] : vector<8x128xf32> to vector<128xf32>
    %12 = vector.shape_cast %11 : vector<128xf32> to vector<1x128xf32>
    %c0_7 = arith.constant 0 : index
    %c0_8 = arith.constant 0 : index
    %c0_9 = arith.constant 0 : index
    %13 = vector.load %arg4[%c0_7, %c0_8, %c0_9] : memref<1x1x128xf32, #tpu.memory_space<vmem>>, vector<1x1x128xf32>
    %14 = vector.shape_cast %13 : vector<1x1x128xf32> to vector<1x128xf32>
    %15 = vector.shape_cast %12 : vector<1x128xf32> to vector<1x1x128xf32>
    tpu.vector_store %arg4[%c0_7, %c0_8, %c0_9], %15 {strides = array<i32>} : memref<1x1x128xf32, #tpu.memory_space<vmem>>, vector<1x1x128xf32>,
    return
  }
  func.func @transform_0(%arg0: i32) -> (i32, i32) {
    %c0_i32 = arith.constant 0 : i32
    %c0_i32_0 = arith.constant 0 : i32
    return %arg0, %c0_i32 : i32, i32
  }
  func.func @transform_1(%arg0: i32) -> (i32, i32) {
    %c0_i32 = arith.constant 0 : i32
    %c0_i32_0 = arith.constant 0 : i32
    return %arg0, %c0_i32 : i32, i32
  }
  func.func @transform_2(%arg0: i32) -> (i32, i32) {
    %c0_i32 = arith.constant 0 : i32
    %c0_i32_0 = arith.constant 0 : i32
    return %arg0, %c0_i32 : i32, i32
  }
  func.func @transform_3(%arg0: i32) -> (i32, i32, i32) {
    %c0_i32 = arith.constant 0 : i32
    %c0_i32_0 = arith.constant 0 : i32
    %c0_i32_1 = arith.constant 0 : i32
    return %arg0, %c0_i32, %c0_i32_0 : i32, i32, i32
  }
}

</mosaic_0001>

<bundles_post_ra>
// kernel: tpu_custom_call.1
= control target key start
LH: loop header
LB: loop body
LE: loop exit
PB: predicated region body
PF: predicated region fallthrough
CT: control target
= control target key end

     0   :  { %9 = vsyncpa [#allocation3], 0  ;;  %s240_s0 = inlined_call_operand.hbm [shape: f32[8,128], index: 0, kind: input, shape index: {}]   ;;  %s241_s1 = inlined_call_operand.hbm [shape: f32[8,128], index: 1, kind: input, shape index: {}]   ;;  %s242_s2 = inlined_call_operand.hbm [shape: f32[8,128], index: 2, kind: output, shape index: {0}]   ;;  %s243_s3 = inlined_call_operand.hbm [shape: f32[1,1,128], index: 3, kind: output, shape index: {1}]  }
   0x1   :  { %10 = vsyncpa [#allocation6], 0 }
   0x2   :  { %11 = vsyncpa [#allocation4], 0 }
   0x3   :  { %12 = vsyncpa [#allocation9], 0  ;;  %s18_s14 = sshll.u32 %s240_s0, 4  ;;  %s204_s15 = smov [#allocation2]   ;;  %s19_s14 = int_to_ptr.hbm [resolvable:$true] %s18_s14 }
   0x4   :  { %s20_s16 = sshll.u32 %s204_s15, 4  ;;  %s29_s19 = sshll.u32 %s241_s1, 4  ;;  %s21_s16 = int_to_ptr.vmem [resolvable:$true] %s20_s16  ;;  %s30_s19 = int_to_ptr.hbm [resolvable:$true] %s29_s19 }
   0x5   :  { %23 = dma.hbm_to_vmem [thread:$0]  %s19_s14, 128, %s21_s16, [#allocation3]  }
   0x6   :  { %s205_s20 = smov [#allocation5]  }
   0x7   :  { %s31_s21 = sshll.u32 %s205_s20, 4  ;;  %s32_s21 = int_to_ptr.vmem [resolvable:$true] %s31_s21 }
   0x8   :  { %34 = dma.hbm_to_vmem [thread:$0]  %s30_s19, 128, %s32_s21, [#allocation6]  }
   0x9   :  { %196 = dma.done.wait [#allocation3], 128  }
   0xa   :  { %197 = vsyncadd [#allocation3], 4294967168 }
   0xb   :  { %198 = dma.done.wait [#allocation6], 128  }
   0xc   :  { %199 = vsyncadd [#allocation6], 4294967168  ;;  %v43_v0 = vld [vmem:[#allocation2] sm:$0xff]  ;;  %v44_v1 = vld [vmem:[#allocation5] sm:$0xff]  ;;  %s206_s0 = smov [#allocation7]   ;;  %s67_s24 = sshll.u32 %s242_s2, 4  ;;  %s68_s24 = int_to_ptr.hbm [resolvable:$true] %s67_s24 }
   0xd   :  { %v48_v2 = vmul.f32 1.442695, %v44_v1  ;;  %v45_v3 = vadd.f32 1.0, %v44_v1  ;;  %v46_v4 = vmul.f32 %v43_v0, %v43_v0  ;;  %s65_s1 = sshll.u32 %s206_s0, 4  ;;  %s207_s25 = smov [#allocation8]   ;;  %s66_s1 = int_to_ptr.vmem [resolvable:$true] %s65_s1 }
   0xe   :  { %s76_s26 = sshll.u32 %s207_s25, 4  ;;  %s78_s29 = sshll.u32 %s243_s3, 4  ;;  %s77_s26 = int_to_ptr.vmem [resolvable:$true] %s76_s26  ;;  %s79_s29 = int_to_ptr.hbm [resolvable:$true] %s78_s29 }
   0xf   :  { %98 = vpow2.f32 %v48_v2  ;;  %v47_v5 = vsub.f32 %v45_v3, %v46_v4 }
  0x15   :  { %v99_v6 = vpop.eup %98 }
  0x16   :  { %v50_v7 = vsub.f32 %v47_v5, %v99_v6 }
  0x18   :  { %v51_v8 = vmul.f32 -0.5, %v50_v7  ;;  %v53_v9 = vrot.slane %v50_v7, 4 }
  0x1a   :  { %52 = vst [vmem:[#allocation7] sm:$0xff] %v51_v8  ;;  %v54_v10 = vadd.f32 %v53_v9, %v50_v7 }
  0x1b   :  { %70 = dma.vmem_to_hbm [thread:$0]  %s66_s1, 128, %s68_s24, [#allocation4]  }
  0x1c   :  { %v55_v11 = vrot.slane %v54_v10, 2 }
  0x1e   :  { %v56_v12 = vadd.f32 %v55_v11, %v54_v10 }
  0x20   :  { %v57_v13 = vrot.slane %v56_v12, 1 }
  0x22   :  { %v58_v14 = vadd.f32 %v57_v13, %v56_v12 }
  0x24   :  { %59 = vst [vmem:[#allocation8] sm:$0x1] %v58_v14 }
  0x25   :  { %81 = dma.vmem_to_hbm [thread:$0]  %s77_s26, 16, %s79_s29, [#allocation9]  }
  0x26   :  { %200 = dma.done.wait [#allocation4], 128  }
  0x27   :  { %201 = vsyncadd [#allocation4], 4294967168 }
  0x28   :  { %202 = dma.done.wait [#allocation9], 16  }
  0x29   :  { %203 = vsyncadd [#allocation9], 4294967280 }
  0x2a   :  { %90 = vsyncpa [#allocation3], 1 }
  0x2b   :  { %91 = vsyncpa [#allocation6], 1 }
  0x2c   :  { %92 = vsyncpa [#allocation4], 1 }
  0x2d   :  { %93 = vsyncpa [#allocation9], 1 }

</bundles_post_ra>
